<compile_context>
chip_gen: v6e
topology: v6e:2x2x1
jax: 0.10.0
libtpu: 0.0.40
codegen_flags: <defaults>
</compile_context>

<pallas_src>
import functools

import jax
import jax.numpy as jnp
import numpy as np
from jax import lax
from jax.experimental import pallas as pl
from jax.experimental.pallas import tpu as pltpu


# ----------------------------------------------------------------------------
# Kernel 1: fused DINO cross-entropy + teacher per-channel partial sums.
#
# Grid: (Bc, nS, ncrops) -- sample b ("parallel"), spatial tile ("parallel"),
# student crop v innermost ("arbitrary").  Teacher + center blocks hold BOTH
# teacher chunks for sample b and stay resident across the whole inner v loop.
# ----------------------------------------------------------------------------
def _dino_ce_mean_kernel(teacher_ref, center_ref, student_ref,
                         loss_ref, csum_ref,
                         q0_ref, qsum_ref, lacc_ref,
                         *, inv_t_temp, inv_s_temp, ncrops, ts, s_valid, masked):
    si = pl.program_id(1)
    v = pl.program_id(2)

    # Student log-softmax: computed exactly once per (b, s_tile, v).
    st = student_ref[0, 0].astype(jnp.float32) * inv_s_temp          # (C, Ts)
    smax = jnp.max(st, axis=0, keepdims=True)
    lse = jnp.log(jnp.sum(jnp.exp(st - smax), axis=0, keepdims=True)) + smax
    logp = st - lse
    if masked:
        # Ragged last spatial tile: zero padded lanes so they contribute 0.
        pos = si * ts + lax.broadcasted_iota(jnp.int32, logp.shape, 1)
        logp = jnp.where(pos < s_valid, logp, 0.0)

    # Once per (b, s_tile): teacher softmax for both chunks (reciprocal +
    # broadcast multiply, no per-element divide), fused update_center channel
    # sums, and the first loss term written straight into the accumulator.
    @pl.when(v == 0)
    def _teacher():
        t_raw = teacher_ref[:, 0].astype(jnp.float32)                # (2, C, Ts)
        c = center_ref[:, 0].astype(jnp.float32)                     # (2, C, Ts)
        logits = (t_raw - c) * inv_t_temp
        logits = logits - jnp.max(logits, axis=1, keepdims=True)
        e = jnp.exp(logits)
        inv_den = 1.0 / jnp.sum(e, axis=1, keepdims=True)            # (2, 1, Ts)
        q = e * inv_den                                              # (2, C, Ts)
        q0_ref[...] = q[0]
        qsum_ref[...] = q[0] + q[1]
        # Student crop v=0 only pairs with teacher chunk iq=1.
        lacc_ref[...] = q[1] * logp
        # update_center(): per-channel sum over (both chunks, spatial tile).
        colsum = jnp.sum(jnp.sum(t_raw, axis=2, keepdims=True), axis=0)   # (C,1)
        csum_ref[...] = jnp.reshape(colsum, csum_ref.shape)

    @pl.when(v == 1)
    def _crop1():                                                    # only iq=0
        lacc_ref[...] = lacc_ref[...] + q0_ref[...] * logp

    @pl.when(v >= 2)
    def _crop_rest():                                                # iq=0 and 1
        lacc_ref[...] = lacc_ref[...] + qsum_ref[...] * logp

    # One XLU reduce + narrow store per (b, s_tile).
    @pl.when(v == ncrops - 1)
    def _flush():
        loss_ref[...] = jnp.reshape(-jnp.sum(lacc_ref[...]), loss_ref.shape)


# ----------------------------------------------------------------------------
# Kernel 2: center EMA  new = center * m + pixel_mean * (1 - m)
# (pixel_mean * (1 - m) is precomputed once in the wrapper).
# ----------------------------------------------------------------------------
def _center_ema_kernel(center_ref, scaled_mean_ref, out_ref, *, momentum):
    c = center_ref[...].astype(jnp.float32)
    out_ref[...] = (c * momentum + scaled_mean_ref[...][None]).astype(out_ref.dtype)


# ----------------------------------------------------------------------------
# Generation-aware sizing helpers.
# ----------------------------------------------------------------------------
def _vmem_capacity_bytes():
    """Physical per-core VMEM; falls back to the smallest current part (v7x)."""
    try:
        info = pltpu.get_tpu_info()
        cap = int(getattr(info, "vmem_capacity_bytes", 0))
        if cap > 0:
            return cap
    except Exception:
        pass
    return 64 * 1024 * 1024


def _round_up(x, m):
    return -(-x // m) * m


def _choose_spatial_tile(S, C, itemsize, budget_bytes):
    """Pick lane-tile Ts (multiple of 128) and padded spatial size S_pad.

    bytes/lane of the CE pipeline: teacher + center (2,1,C,Ts) up to 3-deep
    buffered, student (1,1,C,Ts) double-buffered, 3x f32 (C,Ts) scratch.
    Never exceeds the budget (fixes the old Ts=S fallback).
    """
    per_lane = (2 * C * itemsize * 3) * 2 + (C * itemsize * 2) + (3 * C * 4)
    cap = max(128, (budget_bytes // max(per_lane, 1)) // 128 * 128)
    s128 = _round_up(S, 128)
    if s128 <= cap:
        return s128, s128                       # one (possibly padded) tile
    if S % 128 == 0:                            # prefer exact divisor: no masking
        best, t = 0, 128
        while t <= cap:
            if S % t == 0:
                best = t
            t += 128
        if best >= cap // 2:
            return best, S
    # Clamp to the budget; pad S up to a multiple of Ts with minimal padding.
    n_tiles = -(-s128 // cap)
    ts = _round_up(-(-S // n_tiles), 128)
    return ts, ts * n_tiles


def _choose_batch_tile(Bt, C, Ts, itemsize, budget_bytes):
    per_b = C * Ts * (itemsize * 4 + 4)         # in + out double-buffered (+slack)
    bb = 1
    for d in range(1, Bt + 1):
        if Bt % d == 0 and d * per_b <= budget_bytes:
            bb = d
    return bb


# ----------------------------------------------------------------------------
# Wrapper: reshapes + pallas_call plumbing.  Returns (total_loss, new_center).
# ----------------------------------------------------------------------------
def dino_loss_seg_forward(student_output, teacher_output, center, epoch, *,
                          ncrops, teacher_temp_schedule, student_temp=0.1,
                          center_momentum=0.9):
    assert ncrops >= 2, "DINO loss needs at least 2 crops"
    Bt, C, D, H, W = teacher_output.shape
    Bc = Bt // 2
    assert Bt == 2 * Bc
    assert student_output.shape[0] == ncrops * Bc
    assert center.shape == teacher_output.shape
    S = D * H * W

    # 128-MiB parts (v5e/v6e) -> bigger tiles / higher scoped-VMEM limit than
    # 64-MiB v7x.
    vmem_cap = _vmem_capacity_bytes()
    if vmem_cap >= 100 * 1024 * 1024:
        ce_budget, vmem_limit = 48 * 1024 * 1024, 64 * 1024 * 1024
    else:
        ce_budget, vmem_limit = 20 * 1024 * 1024, 32 * 1024 * 1024

    in_itemsize = max(jnp.dtype(teacher_output.dtype).itemsize,
                      jnp.dtype(student_output.dtype).itemsize,
                      jnp.dtype(center.dtype).itemsize)
    Ts, S_pad = _choose_spatial_tile(S, C, in_itemsize, ce_budget)
    nS = S_pad // Ts
    masked = S_pad != S

    # Keep native dtypes for the HBM->VMEM DMA; upcast to f32 inside kernels.
    t_flat = teacher_output.reshape(2, Bc, C, S)
    c_flat = center.reshape(2, Bc, C, S)
    s_flat = student_output.reshape(ncrops, Bc, C, S)
    if masked:
        pad = ((0, 0), (0, 0), (0, 0), (0, S_pad - S))
        t_flat = jnp.pad(t_flat, pad)
        c_flat = jnp.pad(c_flat, pad)
        s_flat = jnp.pad(s_flat, pad)

    inv_t_temp = 1.0 / float(teacher_temp_schedule[epoch])
    inv_s_temp = 1.0 / float(student_temp)

    kernel = functools.partial(
        _dino_ce_mean_kernel, inv_t_temp=inv_t_temp, inv_s_temp=inv_s_temp,
        ncrops=ncrops, ts=Ts, s_valid=S, masked=masked)

    def _run_ce(use_buffered):
        # Deeper buffering on teacher/center hides their (4x-sized) DMA at each
        # s-tile boundary; the student stream is already steady-state.
        tc_extra = {"pipeline_mode": pl.Buffered(3)} if use_buffered else {}
        return pl.pallas_call(
            kernel,
            out_shape=(jax.ShapeDtypeStruct((Bc, nS, 1, 1), jnp.float32),
                       jax.ShapeDtypeStruct((Bc, nS, C, 1), jnp.float32)),
            grid=(Bc, nS, ncrops),
            in_specs=[
                # teacher: both chunks for sample b; resident across inner v loop
                pl.BlockSpec((2, 1, C, Ts), lambda b, s, v: (0, b, 0, s),
                             **tc_extra),
                # center: same indexing as teacher
                pl.BlockSpec((2, 1, C, Ts), lambda b, s, v: (0, b, 0, s),
                             **tc_extra),
                # student: the only input changing every inner step
                pl.BlockSpec((1, 1, C, Ts), lambda b, s, v: (v, b, 0, s)),
            ],
            out_specs=(
                pl.BlockSpec((1, 1, 1, 1), lambda b, s, v: (b, s, 0, 0)),
                pl.BlockSpec((1, 1, C, 1), lambda b, s, v: (b, s, 0, 0)),
            ),
            scratch_shapes=[pltpu.VMEM((C, Ts), jnp.float32),   # q0
                            pltpu.VMEM((C, Ts), jnp.float32),   # q0 + q1
                            pltpu.VMEM((C, Ts), jnp.float32)],  # loss accumulator
            compiler_params=pltpu.CompilerParams(
                # Per-(b, s) outputs -> both axes can shard across TensorCores.
                dimension_semantics=("parallel", "parallel", "arbitrary"),
                vmem_limit_bytes=vmem_limit),
        )(t_flat, c_flat, s_flat)

    try:
        loss_partials, csum_partials = _run_ce(True)
    except Exception:   # pipeline_mode unsupported -> default double-buffering
        loss_partials, csum_partials = _run_ce(False)

    n_loss_terms = 2 * ncrops - 2
    loss = jnp.sum(loss_partials) * (1.0 / (n_loss_terms * Bc * S))

    # update_center(): finish the fused per-channel mean; precompute the
    # (1 - momentum) scaling once.
    pixel_mean = jnp.sum(csum_partials, axis=(0, 1)) * (1.0 / (Bt * S))   # (C, 1)
    scaled_mean = (pixel_mean * (1.0 - center_momentum)).astype(jnp.float32)

    # Center EMA, aliased onto the center buffer (in-place when XLA allows).
    center_rows = center.reshape(Bt, C, S)
    if masked:
        center_rows = jnp.pad(center_rows, ((0, 0), (0, 0), (0, S_pad - S)))
    Bb = _choose_batch_tile(Bt, C, Ts, jnp.dtype(center.dtype).itemsize, ce_budget)
    new_center = pl.pallas_call(
        functools.partial(_center_ema_kernel, momentum=center_momentum),
        out_shape=jax.ShapeDtypeStruct((Bt, C, S_pad), center.dtype),
        grid=(Bt // Bb, nS),
        in_specs=[pl.BlockSpec((Bb, C, Ts), lambda i, j: (i, 0, j)),
                  pl.BlockSpec((C, 1), lambda i, j: (0, 0))],
        out_specs=pl.BlockSpec((Bb, C, Ts), lambda i, j: (i, 0, j)),
        input_output_aliases={0: 0},
        compiler_params=pltpu.CompilerParams(
            dimension_semantics=("parallel", "parallel"),
            vmem_limit_bytes=vmem_limit),
    )(center_rows, scaled_mean)
    if masked:
        new_center = new_center[..., :S]
    new_center = new_center.reshape(center.shape)

    return loss, new_center


# ----------------------------------------------------------------------------
# Pure-JAX reference (mirrors the PyTorch forward + update_center)
# ----------------------------------------------------------------------------
def _reference(student_output, teacher_output, center, epoch, ncrops, schedule,
               student_temp, center_momentum):
    s = student_output / student_temp
    s_chunks = jnp.split(s, ncrops, axis=0)
    temp = float(schedule[epoch])
    t = jax.nn.softmax((teacher_output - center) / temp, axis=1)
    t_chunks = jnp.split(t, 2, axis=0)
    total, n = 0.0, 0
    for iq, q in enumerate(t_chunks):
        for v in range(ncrops):
            if v == iq:
                continue
            logp = jax.nn.log_softmax(s_chunks[v], axis=1)
            total = total + jnp.mean(jnp.sum(-q * logp, axis=1))
            n += 1
    ce = total / n
    pixel_center = jnp.mean(teacher_output, axis=(0, 2, 3, 4), keepdims=True)
    new_center = center * center_momentum + pixel_center * (1 - center_momentum)
    return ce, new_center


if __name__ == "__main__":
    # Small synthetic config consistent with the module's forward:
    #   ncrops student crops, 2 teacher crops, 5-D NCDHW volumes.
    ncrops = 3
    Bc = 2                      # samples per crop chunk
    C, D, H, W = 4, 8, 8, 8     # S = 512 (lane-aligned)
    nepochs = 10
    warmup_teacher_temp, teacher_temp, warmup_epochs = 0.04, 0.07, 3
    schedule = np.concatenate(
        (np.linspace(warmup_teacher_temp, teacher_temp, warmup_epochs),
         np.ones(nepochs - warmup_epochs) * teacher_temp))
    epoch = 2
    student_temp = 0.1
    center_momentum = 0.9

    key = jax.random.PRNGKey(0)
    k1, k2, k3 = jax.random.split(key, 3)
    student = jax.random.normal(k1, (ncrops * Bc, C, D, H, W), jnp.float32)
    teacher = jax.random.normal(k2, (2 * Bc, C, D, H, W), jnp.float32)
    # The registered buffer is zeros at __init__; a small deterministic nonzero
    # center is used here so the centering path is numerically exercised.
    center = 0.1 * jax.random.normal(k3, (2 * Bc, C, D, H, W), jnp.float32)

    # Reference computed first (EMA output is aliased onto its input buffer).
    ref_loss, ref_center = _reference(student, teacher, center, epoch, ncrops,
                                      schedule, student_temp, center_momentum)
    jax.block_until_ready((ref_loss, ref_center))

    loss, new_center = dino_loss_seg_forward(
        student, teacher, center, epoch,
        ncrops=ncrops, teacher_temp_schedule=schedule,
        student_temp=student_temp, center_momentum=center_momentum)
    jax.block_until_ready((loss, new_center))

    assert np.allclose(np.asarray(loss), np.asarray(ref_loss),
                       rtol=1e-4, atol=1e-4), (float(loss), float(ref_loss))
    assert np.allclose(np.asarray(new_center), np.asarray(ref_center),
                       rtol=1e-5, atol=1e-6)
    assert new_center.dtype == center.dtype
    print("KERNEL_OK")
</pallas_src>

<mosaic_0001>
module attributes {stable_mosaic.version = 11 : i64} {
  func.func @_dino_ce_mean_kernel(%arg0: i32, %arg1: i32, %arg2: i32, %arg3: memref<2x1x4x512xf32, #tpu.memory_space<vmem>>, %arg4: memref<2x1x4x512xf32, #tpu.memory_space<vmem>>, %arg5: memref<1x1x4x512xf32, #tpu.memory_space<vmem>>, %arg6: memref<1x1x1x1xf32, #tpu.memory_space<vmem>>, %arg7: memref<1x1x4x1xf32, #tpu.memory_space<vmem>>, %arg8: memref<4x512xf32, #tpu.memory_space<vmem>>, %arg9: memref<4x512xf32, #tpu.memory_space<vmem>>, %arg10: memref<4x512xf32, #tpu.memory_space<vmem>>) attributes {dimension_semantics = [#tpu.dimension_semantics<parallel>, #tpu.dimension_semantics<parallel>, #tpu.dimension_semantics<arbitrary>], iteration_bounds = array<i64: 2, 1, 3>, scalar_prefetch = 0 : i64, scratch_operands = 3 : i64, tpu.core_type = #tpu.core_type<tc>, window_params = [{transform_indices = @transform_0, window_bounds = array<i64: 2, 1, 4, 512>}, {transform_indices = @transform_1, window_bounds = array<i64: 2, 1, 4, 512>}, {transform_indices = @transform_2, window_bounds = array<i64: 1, 1, 4, 512>}, {transform_indices = @transform_3, window_bounds = array<i64: 1, 1, 1, 1>}, {transform_indices = @transform_4, window_bounds = array<i64: 1, 1, 4, 1>}]} {
    %c0 = arith.constant 0 : index
    %c0_0 = arith.constant 0 : index
    %c0_1 = arith.constant 0 : index
    %c0_2 = arith.constant 0 : index
    %0 = vector.load %arg5[%c0, %c0_0, %c0_1, %c0_2] : memref<1x1x4x512xf32, #tpu.memory_space<vmem>>, vector<1x1x4x512xf32>
    %1 = vector.shape_cast %0 : vector<1x1x4x512xf32> to vector<4x512xf32>
    %cst = arith.constant 1.000000e+01 : f32
    %2 = vector.broadcast %cst : f32 to vector<4x512xf32>
    %3 = arith.mulf %1, %2 : vector<4x512xf32>
    %cst_3 = arith.constant dense<0xFF800000> : vector<512xf32>
    %4 = vector.multi_reduction <maximumf>, %3, %cst_3 [0] : vector<4x512xf32> to vector<512xf32>
    %5 = vector.shape_cast %4 : vector<512xf32> to vector<1x512xf32>
    %6 = vector.broadcast %5 : vector<1x512xf32> to vector<4x512xf32>
    %7 = arith.subf %3, %6 : vector<4x512xf32>
    %8 = math.exp %7 : vector<4x512xf32>
    %cst_4 = arith.constant dense<0.000000e+00> : vector<512xf32>
    %9 = vector.multi_reduction <add>, %8, %cst_4 [0] : vector<4x512xf32> to vector<512xf32>
    %10 = vector.shape_cast %9 : vector<512xf32> to vector<1x512xf32>
    %11 = math.log %10 : vector<1x512xf32>
    %12 = arith.addf %11, %5 : vector<1x512xf32>
    %13 = vector.broadcast %12 : vector<1x512xf32> to vector<4x512xf32>
    %14 = arith.subf %3, %13 : vector<4x512xf32>
    %c0_i32 = arith.constant 0 : i32
    %15 = arith.cmpi eq, %arg2, %c0_i32 : i32
    %16 = arith.extui %15 : i1 to i32
    %c0_i32_5 = arith.constant 0 : i32
    %17 = arith.cmpi ne, %16, %c0_i32_5 : i32
    scf.if %17 {
      %c0_10 = arith.constant 0 : index
      %c0_11 = arith.constant 0 : index
      %c0_12 = arith.constant 0 : index
      %c0_13 = arith.constant 0 : index
      %27 = vector.load %arg3[%c0_10, %c0_11, %c0_12, %c0_13] : memref<2x1x4x512xf32, #tpu.memory_space<vmem>>, vector<2x1x4x512xf32>
      %28 = vector.shape_cast %27 : vector<2x1x4x512xf32> to vector<2x4x512xf32>
      %c0_14 = arith.constant 0 : index
      %c0_15 = arith.constant 0 : index
      %c0_16 = arith.constant 0 : index
      %c0_17 = arith.constant 0 : index
      %29 = vector.load %arg4[%c0_14, %c0_15, %c0_16, %c0_17] : memref<2x1x4x512xf32, #tpu.memory_space<vmem>>, vector<2x1x4x512xf32>
      %30 = vector.shape_cast %29 : vector<2x1x4x512xf32> to vector<2x4x512xf32>
      %31 = arith.subf %28, %30 : vector<2x4x512xf32>
      %cst_18 = arith.constant 14.2857141 : f32
      %32 = vector.broadcast %cst_18 : f32 to vector<2x4x512xf32>
      %33 = arith.mulf %31, %32 : vector<2x4x512xf32>
      %cst_19 = arith.constant dense<0xFF800000> : vector<2x512xf32>
      %34 = vector.multi_reduction <maximumf>, %33, %cst_19 [1] : vector<2x4x512xf32> to vector<2x512xf32>
      %35 = vector.shape_cast %34 : vector<2x512xf32> to vector<2x1x512xf32>
      %36 = vector.broadcast %35 : vector<2x1x512xf32> to vector<2x4x512xf32>
      %37 = arith.subf %33, %36 : vector<2x4x512xf32>
      %38 = math.exp %37 : vector<2x4x512xf32>
      %cst_20 = arith.constant dense<0.000000e+00> : vector<2x512xf32>
      %39 = vector.multi_reduction <add>, %38, %cst_20 [1] : vector<2x4x512xf32> to vector<2x512xf32>
      %40 = vector.shape_cast %39 : vector<2x512xf32> to vector<2x1x512xf32>
      %cst_21 = arith.constant 1.000000e+00 : f32
      %41 = vector.broadcast %cst_21 : f32 to vector<2x1x512xf32>
      %42 = arith.divf %41, %40 : vector<2x1x512xf32>
      %43 = vector.broadcast %42 : vector<2x1x512xf32> to vector<2x4x512xf32>
      %44 = arith.mulf %38, %43 : vector<2x4x512xf32>
      %45 = vector.extract_strided_slice %44 {offsets = [0, 0, 0], sizes = [1, 4, 512], strides = [1, 1, 1]} : vector<2x4x512xf32> to vector<1x4x512xf32>
      %46 = vector.shape_cast %45 : vector<1x4x512xf32> to vector<4x512xf32>
      %c0_22 = arith.constant 0 : index
      %c0_23 = arith.constant 0 : index
      %47 = vector.load %arg8[%c0_22, %c0_23] : memref<4x512xf32, #tpu.memory_space<vmem>>, vector<4x512xf32>
      tpu.vector_store %arg8[%c0_22, %c0_23], %46 {strides = array<i32>} : memref<4x512xf32, #tpu.memory_space<vmem>>, vector<4x512xf32>,
      %48 = vector.extract_strided_slice %44 {offsets = [0, 0, 0], sizes = [1, 4, 512], strides = [1, 1, 1]} : vector<2x4x512xf32> to vector<1x4x512xf32>
      %49 = vector.shape_cast %48 : vector<1x4x512xf32> to vector<4x512xf32>
      %50 = vector.extract_strided_slice %44 {offsets = [1, 0, 0], sizes = [1, 4, 512], strides = [1, 1, 1]} : vector<2x4x512xf32> to vector<1x4x512xf32>
      %51 = vector.shape_cast %50 : vector<1x4x512xf32> to vector<4x512xf32>
      %52 = arith.addf %49, %51 : vector<4x512xf32>
      %c0_24 = arith.constant 0 : index
      %c0_25 = arith.constant 0 : index
      %53 = vector.load %arg9[%c0_24, %c0_25] : memref<4x512xf32, #tpu.memory_space<vmem>>, vector<4x512xf32>
      tpu.vector_store %arg9[%c0_24, %c0_25], %52 {strides = array<i32>} : memref<4x512xf32, #tpu.memory_space<vmem>>, vector<4x512xf32>,
      %54 = vector.extract_strided_slice %44 {offsets = [1, 0, 0], sizes = [1, 4, 512], strides = [1, 1, 1]} : vector<2x4x512xf32> to vector<1x4x512xf32>
      %55 = vector.shape_cast %54 : vector<1x4x512xf32> to vector<4x512xf32>
      %56 = arith.mulf %55, %14 : vector<4x512xf32>
      %c0_26 = arith.constant 0 : index
      %c0_27 = arith.constant 0 : index
      %57 = vector.load %arg10[%c0_26, %c0_27] : memref<4x512xf32, #tpu.memory_space<vmem>>, vector<4x512xf32>
      tpu.vector_store %arg10[%c0_26, %c0_27], %56 {strides = array<i32>} : memref<4x512xf32, #tpu.memory_space<vmem>>, vector<4x512xf32>,
      %cst_28 = arith.constant dense<0.000000e+00> : vector<2x4xf32>
      %58 = vector.multi_reduction <add>, %28, %cst_28 [2] : vector<2x4x512xf32> to vector<2x4xf32>
      %59 = vector.shape_cast %58 : vector<2x4xf32> to vector<2x4x1xf32>
      %cst_29 = arith.constant dense<0.000000e+00> : vector<4x1xf32>
      %60 = vector.multi_reduction <add>, %59, %cst_29 [0] : vector<2x4x1xf32> to vector<4x1xf32>
      %61 = vector.shape_cast %60 : vector<4x1xf32> to vector<1x1x4x1xf32>
      %c0_30 = arith.constant 0 : index
      %c0_31 = arith.constant 0 : index
      %c0_32 = arith.constant 0 : index
      %c0_33 = arith.constant 0 : index
      %62 = vector.load %arg7[%c0_30, %c0_31, %c0_32, %c0_33] : memref<1x1x4x1xf32, #tpu.memory_space<vmem>>, vector<1x1x4x1xf32>
      tpu.vector_store %arg7[%c0_30, %c0_31, %c0_32, %c0_33], %61 {strides = array<i32>} : memref<1x1x4x1xf32, #tpu.memory_space<vmem>>, vector<1x1x4x1xf32>,
    } else {
    }
    %c1_i32 = arith.constant 1 : i32
    %18 = arith.cmpi eq, %arg2, %c1_i32 : i32
    %19 = arith.extui %18 : i1 to i32
    %c0_i32_6 = arith.constant 0 : i32
    %20 = arith.cmpi ne, %19, %c0_i32_6 : i32
    scf.if %20 {
      %c0_10 = arith.constant 0 : index
      %c0_11 = arith.constant 0 : index
      %27 = vector.load %arg10[%c0_10, %c0_11] : memref<4x512xf32, #tpu.memory_space<vmem>>, vector<4x512xf32>
      %c0_12 = arith.constant 0 : index
      %c0_13 = arith.constant 0 : index
      %28 = vector.load %arg8[%c0_12, %c0_13] : memref<4x512xf32, #tpu.memory_space<vmem>>, vector<4x512xf32>
      %29 = arith.mulf %28, %14 : vector<4x512xf32>
      %30 = arith.addf %27, %29 : vector<4x512xf32>
      %c0_14 = arith.constant 0 : index
      %c0_15 = arith.constant 0 : index
      %31 = vector.load %arg10[%c0_14, %c0_15] : memref<4x512xf32, #tpu.memory_space<vmem>>, vector<4x512xf32>
      tpu.vector_store %arg10[%c0_14, %c0_15], %30 {strides = array<i32>} : memref<4x512xf32, #tpu.memory_space<vmem>>, vector<4x512xf32>,
    } else {
    }
    %c2_i32 = arith.constant 2 : i32
    %21 = arith.cmpi sge, %arg2, %c2_i32 : i32
    %22 = arith.extui %21 : i1 to i32
    %c0_i32_7 = arith.constant 0 : i32
    %23 = arith.cmpi ne, %22, %c0_i32_7 : i32
    scf.if %23 {
      %c0_10 = arith.constant 0 : index
      %c0_11 = arith.constant 0 : index
      %27 = vector.load %arg10[%c0_10, %c0_11] : memref<4x512xf32, #tpu.memory_space<vmem>>, vector<4x512xf32>
      %c0_12 = arith.constant 0 : index
      %c0_13 = arith.constant 0 : index
      %28 = vector.load %arg9[%c0_12, %c0_13] : memref<4x512xf32, #tpu.memory_space<vmem>>, vector<4x512xf32>
      %29 = arith.mulf %28, %14 : vector<4x512xf32>
      %30 = arith.addf %27, %29 : vector<4x512xf32>
      %c0_14 = arith.constant 0 : index
      %c0_15 = arith.constant 0 : index
      %31 = vector.load %arg10[%c0_14, %c0_15] : memref<4x512xf32, #tpu.memory_space<vmem>>, vector<4x512xf32>
      tpu.vector_store %arg10[%c0_14, %c0_15], %30 {strides = array<i32>} : memref<4x512xf32, #tpu.memory_space<vmem>>, vector<4x512xf32>,
    } else {
    }
    %c2_i32_8 = arith.constant 2 : i32
    %24 = arith.cmpi eq, %arg2, %c2_i32_8 : i32
    %25 = arith.extui %24 : i1 to i32
    %c0_i32_9 = arith.constant 0 : i32
    %26 = arith.cmpi ne, %25, %c0_i32_9 : i32
    scf.if %26 {
      %c0_10 = arith.constant 0 : index
      %c0_11 = arith.constant 0 : index
      %27 = vector.load %arg10[%c0_10, %c0_11] : memref<4x512xf32, #tpu.memory_space<vmem>>, vector<4x512xf32>
      %28 = vector.shape_cast %27 : vector<4x512xf32> to vector<1x4x512xf32>
      %cst_12 = arith.constant dense<0.000000e+00> : vector<1xf32>
      %29 = vector.multi_reduction <add>, %28, %cst_12 [1, 2] : vector<1x4x512xf32> to vector<1xf32>
      %30 = vector.shape_cast %29 : vector<1xf32> to vector<1x1x1xf32>
      %31 = vector.extract %30[0, 0, 0] : f32 from vector<1x1x1xf32>
      %cst_13 = arith.constant 0.000000e+00 : f32
      %32 = arith.subf %cst_13, %31 : f32
      %33 = vector.broadcast %32 : f32 to vector<1x1x1x1xf32>
      %c0_14 = arith.constant 0 : index
      %c0_15 = arith.constant 0 : index
      %c0_16 = arith.constant 0 : index
      %c0_17 = arith.constant 0 : index
      %34 = vector.load %arg6[%c0_14, %c0_15, %c0_16, %c0_17] : memref<1x1x1x1xf32, #tpu.memory_space<vmem>>, vector<1x1x1x1xf32>
      tpu.vector_store %arg6[%c0_14, %c0_15, %c0_16, %c0_17], %33 {strides = array<i32>} : memref<1x1x1x1xf32, #tpu.memory_space<vmem>>, vector<1x1x1x1xf32>,
    } else {
    }
    return
  }
  func.func @transform_0(%arg0: i32, %arg1: i32, %arg2: i32) -> (i32, i32, i32, i32) {
    %c0_i32 = arith.constant 0 : i32
    %c0_i32_0 = arith.constant 0 : i32
    %c0_i32_1 = arith.constant 0 : i32
    return %c0_i32, %arg0, %c0_i32_0, %arg1 : i32, i32, i32, i32
  }
  func.func @transform_1(%arg0: i32, %arg1: i32, %arg2: i32) -> (i32, i32, i32, i32) {
    %c0_i32 = arith.constant 0 : i32
    %c0_i32_0 = arith.constant 0 : i32
    %c0_i32_1 = arith.constant 0 : i32
    return %c0_i32, %arg0, %c0_i32_0, %arg1 : i32, i32, i32, i32
  }
  func.func @transform_2(%arg0: i32, %arg1: i32, %arg2: i32) -> (i32, i32, i32, i32) {
    %c0_i32 = arith.constant 0 : i32
    %c0_i32_0 = arith.constant 0 : i32
    return %arg2, %arg0, %c0_i32, %arg1 : i32, i32, i32, i32
  }
  func.func @transform_3(%arg0: i32, %arg1: i32, %arg2: i32) -> (i32, i32, i32, i32) {
    %c0_i32 = arith.constant 0 : i32
    %c0_i32_0 = arith.constant 0 : i32
    %c0_i32_1 = arith.constant 0 : i32
    return %arg0, %arg1, %c0_i32, %c0_i32_0 : i32, i32, i32, i32
  }
  func.func @transform_4(%arg0: i32, %arg1: i32, %arg2: i32) -> (i32, i32, i32, i32) {
    %c0_i32 = arith.constant 0 : i32
    %c0_i32_0 = arith.constant 0 : i32
    %c0_i32_1 = arith.constant 0 : i32
    return %arg0, %arg1, %c0_i32, %c0_i32_0 : i32, i32, i32, i32
  }
}

</mosaic_0001>

<bundles_post_ra>
// kernel: tpu_custom_call.1
= control target key start
LH: loop header
LB: loop body
LE: loop exit
PB: predicated region body
PF: predicated region fallthrough
CT: control target
= control target key end

     0   :  { %s1746_s0 = inlined_call_operand.hbm [shape: f32[2,2,4,512], index: 0, kind: input, shape index: {}]   ;;  %s1747_s1 = inlined_call_operand.hbm [shape: f32[2,2,4,512], index: 1, kind: input, shape index: {}]   ;;  %s1748_s2 = inlined_call_operand.hbm [shape: f32[3,2,4,512], index: 2, kind: input, shape index: {}]   ;;  %s1749_s3 = inlined_call_operand.vmem [shape: f32[2,1,1,1], index: 3, kind: output, shape index: {0}]   ;;  %s1750_s4 = inlined_call_operand.vmem [shape: f32[2,1,4,1], index: 4, kind: output, shape index: {1}]  }
   0x1   :  { %1754 = sst [smem:[#allocation15_spill]] %s1746_s0 }
   0x2   :  { %1755 = sst [smem:[#allocation16_spill]] %s1747_s1 }
   0x3   :  { %1756 = sst [smem:[#allocation17_spill]] %s1749_s3 }
   0x4   :  { %1757 = sst [smem:[#allocation18_spill]] %s1750_s4 }
   0x5   :  { %10 = vsyncpa [#allocation6], 0 }
   0x6   :  { %12 = vsyncpa [#allocation6 + $0x1], 0 }
   0x7   :  { %13 = vsyncpa [#allocation8], 0 }
   0x8   :  { %15 = vsyncpa [#allocation8 + $0x1], 0  ;;  %s1360_s15 = smov 0   ;;  %s1362_s16 = smov 0  }
   0x9   :  { %s1364_s17 = smov 0   ;;  %s1366_s18 = smov 0  }
   0xa   :  { %s1368_s19 = smov 0   ;;  %s1370_s20 = smov 0  }
   0xb   :  { %s1372_s21 = smov 0   ;;  %s1374_s22 = smov 0  }
   0xc   :  { %s1376_s23 = smov 0   ;;  %s1378_s24 = smov 0  }
   0xd   :  { %s1380_s25 = smov 0  }
   0xe LB: > { %1758 = sst [smem:[#allocation13_spill]] %s1311_s21  ;;  %p56_p0 = scmp.ne.s32.totalorder %s1307_s20, %s1303_s19  ;;  %s1327_s25 = sphi %s1380_s25, %s21_s25   ;;  %s1323_s24 = sphi %s1378_s24, %s1787_s24   ;;  %s1319_s23 = sphi %s1376_s23, %s1786_s23   ;;  %s1315_s22 = sphi %s1374_s22, %s1785_s22   ;;  %s1311_s21 = sphi %s1372_s21, %s1784_s21   ;;  %s1307_s20 = sphi %s1370_s20, %s1783_s20   ;;  %s1303_s19 = sphi %s1368_s19, %s1782_s19   ;;  %s1299_s18 = sphi %s1366_s18, %s1781_s18   ;;  %s1295_s17 = sphi %s1364_s17, %s1780_s17   ;;  %s1291_s16 = sphi %s1362_s16, %s1779_s16   ;;  %s1287_s15 = sphi %s1360_s15, %s1778_s15  }
   0xf   : > { %p57_p1 = scmp.eq.s32.totalorder %s1327_s25, 0  ;;  %p62_p2 = scmp.ne.s32.totalorder %s1303_s19, %s1299_s18 }
  0x10   : > { %p1011_p4 = scmp.lt.s32.totalorder %s1327_s25, 6  ;;  %s1751_s26 = sand.u32 1, %s1307_s20  }
  0x11   : > { %p58_p3 = por %p57_p1, %p56_p0  ;;  %s991_s27 = sshll.u32 %s1323_s24, 8 }
  0x12   : > { %s1427_s28 = sshll.u32 %s1751_s26, 5  ;;  %s223_s30 = sand.u32 1, %s1327_s25  }
  0x13   : > { %p1431_p5 = pnand %p1011_p4, %p58_p3  ;;  %s1760_s1 = sld [smem:[#allocation16_spill]] }
  0x14   : > { %s227_s8 = scalar_lea.vmem [#allocation7], %s1427_s28  ;;  %p980_p6 = scmp.ge.s32.totalorder %s1327_s25, 1 }
  0x15   : > { %s236_s9 = sshll.u32 %s227_s8, 4  ;;  %p267_p7 = scmp.lt.s32.totalorder %s1327_s25, 7  ;;  %s237_s9 = int_to_ptr.vmem [resolvable:$true] %s236_s9 }
  0x16   : > { %s1444_s10 = scalar_lea.sflag [#allocation8], %s223_s30  ;;  %p1147_p8 = pneg %p1431_p5 }
  0x17   : > { %s1158_s11 = scalar_lea.vmem %s237_s9, 512  ;;  %s1329_s12 = smov [#allocation7]  }
  0x18   : > { %p1159_p9 = scmp.ne.s32.totalorder %s237_s9, %s1158_s11  ;;  %s1163_s13 = sshll.u32 %s1329_s12, 4  ;;  %s1164_s13 = int_to_ptr.vmem [resolvable:$false] %s1163_s13 }
  0x19   : > { %s235_s7 = scalar_lea.hbm %s1760_s1, %s991_s27  ;;  %s1165_s14 = scalar_lea.vmem %s1164_s13, 1024 }
  0x1a   : > { %p1161_p10 = pnand %p1159_p9, %p1147_p8  ;;  %p1166_p12 = scmp.lt.s32.totalorder %s237_s9, %s1164_s13 }
  0x1b   : > { %p1167_p13 = scmp.lt.s32.totalorder %s1165_s14, %s1158_s11 }
  0x1c   : > { %p1162_p11 = pneg %p1161_p10 }
  0x1d   : > { %p1168_p0 = por %p1167_p13, %p1166_p12 }
  0x1f   : > { %p1169_p3 = pnand %p1168_p0, %p1162_p11 }
  0x21   : > { %1172 = shalt.err (!%p1169_p3)
}
  0x22   : > { %s1330_s5 = smov 512   ;;  %s1331_s30 = smov 256  }
  0x23   : > { %s1332_s6 = smov 16   ;;  %p1458_p9 = pnand %p980_p6, %p267_p7 }
  0x24   : > { %1007 = dma.hbm_to_vmem [thread:$0]  (!%p1431_p5), %s235_s7, 512, %s237_s9, %s1444_s10, %s1330_s5, %s1331_s30, %s1332_s6  }
  0x25   : > { %s1762_s0 = sld [smem:[#allocation15_spill]]  ;;  %s204_s14 = scalar_lea.vmem [#allocation5], %s1427_s28 }
  0x26   : > { %s213_s26 = sshll.u32 %s204_s14, 4  ;;  %s1763_s1 = sand.u32 1, %s1307_s20   ;;  %s214_s26 = int_to_ptr.vmem [resolvable:$true] %s213_s26 }
  0x27   : > { %s201_s21 = scalar_lea.sflag [#allocation6], %s1763_s1  ;;  %s1186_s4 = scalar_lea.vmem %s214_s26, 512 }
  0x28   : > { %p1187_p10 = scmp.ne.s32.totalorder %s214_s26, %s1186_s4  ;;  %s1333_s7 = smov [#allocation5]  }
  0x29   : > { %s1191_s9 = sshll.u32 %s1333_s7, 4  ;;  %s1192_s9 = int_to_ptr.vmem [resolvable:$false] %s1191_s9 }
  0x2a   : > { %p1189_p11 = pnand %p1187_p10, %p1147_p8  ;;  %s1193_s3 = scalar_lea.vmem %s1192_s9, 1024 }
  0x2b   : > { %s212_s13 = scalar_lea.hbm %s1762_s0, %s991_s27  ;;  %p1194_p6 = scmp.lt.s32.totalorder %s214_s26, %s1192_s9 }
  0x2c   : > { %p1190_p12 = pneg %p1189_p11  ;;  %p1195_p7 = scmp.lt.s32.totalorder %s1193_s3, %s1186_s4 }
  0x2e   : > { %p1196_p13 = por %p1195_p7, %p1194_p6 }
  0x30   : > { %p1197_p0 = pnand %p1196_p13, %p1190_p12 }
  0x32   : > { %1200 = shalt.err (!%p1197_p0)
}
  0x33   : > { %1004 = dma.hbm_to_vmem [thread:$0]  (!%p1431_p5), %s212_s13, 512, %s214_s26, %s201_s21, %s1330_s5, %s1331_s30, %s1332_s6  }
  0x34   : > { %s1752_s1 = sadd.s32 4294967295, %s1327_s25   ;;  %s33_s3 = sadd.s32 1, %s1319_s23 }
  0x35   : > { %p34_p8 = scmp.ge.s32.totalorder %s33_s3, 3  ;;  %s40_s4 = sadd.s32 1, %s1323_s24 }
  0x36   : > { %s49_s27 = sadd.s32 1, %s1307_s20  ;;  %p63_p3 = scmp.eq.s32.totalorder %s1752_s1, 0 }
  0x37   : > { %s1789_s3 = smov (%p34_p8, %s33_s3), 0  ;;  %s1791_s4 = smov (!%p34_p8, %s40_s4), %s1323_s24 }
  0x38   : > { %p1487_p10 = por %p63_p3, %p62_p2  ;;  %s100_s21 = ssub.s32 %s1319_s23, %s1789_s3 }
  0x39   : > { %p42_p5 = scmp.ge.s32.totalorder %s1791_s4, 2  ;;  %s107_s26 = sadd.s32 1, %s1295_s17 }
  0x3a   : > { %p114_p11 = scmp.ne.s32.totalorder %s1295_s17, %s1291_s16  ;;  %p120_p12 = scmp.ne.s32.totalorder %s1291_s16, %s1287_s15 }
  0x3b   : > { %s1793_s4 = smov (%p42_p5, %s1791_s4), 0  ;;  %s248_s30 = sand.u32 1, %s1295_s17  }
  0x3c   : > { %1765 = sst [smem:[#allocation14_spill]] %s1793_s4  ;;  %p1502_p6 = por %p114_p11, %p57_p1 }
  0x3d   : > { %p1506_p2 = por %p120_p12, %p63_p3  ;;  %s44_s5 = ssub.s32 %s1323_s24, %s1793_s4 }
  0x3e   : > { %p47_p7 = scmp.eq.s32.totalorder %s44_s5, 0  ;;  %s102_s6 = sor.u32 %s100_s21, %s44_s5 }
  0x3f   : > { %p105_p13 = scmp.eq.s32.totalorder %s102_s6, 0  ;;  %s976_s15 = sshll.u32 %s248_s30, 4 }
  0x40   : > { %s1514_s11 = scalar_select %p47_p7, %s1307_s20, %s49_s27  }
  0x41   : > { %s1517_s12 = scalar_select %p105_p13, %s1295_s17, %s107_s26  }
  0x42   : > { %s977_s13 = sshll.u32 %s1323_s24, 2  ;;  %s978_s14 = sshll.u32 %s1319_s23, 3 }
  0x43   : > { %s250_s7 = scalar_lea.vmem [#allocation9], %s976_s15  ;;  %s258_s1 = sadd.s32 %s978_s14, %s977_s13 }
  0x44   : > { %s262_s9 = sshll.u32 %s250_s7, 4  ;;  %s979_s0 = sshll.u32 %s258_s1, 6  ;;  %s263_s9 = int_to_ptr.vmem [resolvable:$true] %s262_s9 }
  0x45   : > { %p1525_p1 = pnand %p1011_p4, %p1502_p6  ;;  %s260_s27 = scalar_lea.hbm %s1748_s2, %s979_s0 }
  0x46   : > { %s1214_s26 = scalar_lea.vmem %s263_s9, 256  ;;  %s1334_s30 = smov [#allocation9]  }
  0x47   : > { %p1203_p0 = pneg %p1525_p1  ;;  %p1215_p8 = scmp.ne.s32.totalorder %s263_s9, %s1214_s26 }
  0x48   : > { %s1219_s6 = sshll.u32 %s1334_s30, 4  ;;  %s1220_s6 = int_to_ptr.vmem [resolvable:$false] %s1219_s6 }
  0x49   : > { %p1217_p3 = pnand %p1215_p8, %p1203_p0  ;;  %s1221_s1 = scalar_lea.vmem %s1220_s6, 512 }
  0x4a   : > { %p1222_p11 = scmp.lt.s32.totalorder %s263_s9, %s1220_s6  ;;  %p1223_p4 = scmp.lt.s32.totalorder %s1221_s1, %s1214_s26 }
  0x4b   : > { %p1218_p5 = pneg %p1217_p3 }
  0x4c   : > { %p1224_p12 = por %p1223_p4, %p1222_p11 }
  0x4e   : > { %p1225_p6 = pnand %p1224_p12, %p1218_p5 }
  0x50   : > { %1228 = shalt.err (!%p1225_p6)
}
  0x51   : > { %1010 = dma.hbm_to_vmem [thread:$0]  (!%p1525_p1), %s260_s27, 256, %s263_s9, %s1444_s10  }
  0x52   : > { %271 = sbr.rel (%p1458_p9) target bundleno = 605 (0x25d), region = 32  ;;  %s273_s0 = sand.u32 (!%p1458_p9), 1, %s1303_s19  }
  0x53   : > { %s981_s29 = sshll.u32 (!%p1458_p9), %s273_s0, 5  ;;  %s274_s15 = scalar_lea.sflag (!%p1458_p9), [#allocation6], %s273_s0 }
  0x54   : > { %s1540_s13 = scalar_lea.vmem (!%p1458_p9), [#allocation5], %s981_s29 }
  0x57   : > { %1274 = dma.done.wait (%p1487_p10), %s274_s15, 512  }
  0x58   : > { %1276 = vsyncadd (%p1487_p10), %s274_s15, 4294966784  ;;  %s1769_s14 = sadd.s32 4294967295, %s1327_s25   ;;  %s1548_s7 = scalar_lea.vmem [#allocation7], %s981_s29 }
  0x59   : > { %s282_s4 = sand.u32 1, %s1769_s14  }
  0x5a   : > { %s283_s10 = scalar_lea.sflag [#allocation8], %s282_s4 }
  0x5b   : > { %1278 = dma.done.wait (%p1487_p10), %s283_s10, 512  }
  0x5c   : > { %1280 = vsyncadd (%p1487_p10), %s283_s10, 4294966784  ;;  %s293_s8 = sand.u32 1, %s1291_s16  }
  0x5d   : > { %s983_s9 = sshll.u32 %s293_s8, 4 }
  0x5e   : > { %s295_s21 = scalar_lea.vmem [#allocation9], %s983_s9 }
  0x5f   : > { %1282 = dma.done.wait (%p1506_p2), %s283_s10, 256  }
  0x60   : > { %1284 = vsyncadd (%p1506_p2), %s283_s10, 4294967040  ;;  %p341_p9 = scmp.lt.s32.totalorder %s1315_s22, 1  ;;  %s1770_s28 = sld [smem:[#allocation17_spill]]  ;;  %v354_v0 = vld [vmem:[%s295_s21] sm:$0xff]  ;;  %v355_v1 = vld [vmem:[%s295_s21 + $0x8] sm:$0xff]  ;;  %vm364_vm0 = vcmask 1043456  }
  0x61   : > { %s1771_s0 = sld [smem:[#allocation18_spill]]  ;;  %v1573_v2 = vmul.f32 10.0, %v354_v0  ;;  %v1575_v3 = vmul.f32 10.0, %v355_v1 }
  0x62   : > { %s1795_s22 = smov (!%p341_p9, %s1315_s22), 1  ;;  %s1772_s18 = sld [smem:[#allocation13_spill]] }
  0x63   : > { %s984_s30 = sshll.u32 %s1795_s22, 2  ;;  %v360_v4 = vcombine.high %v1573_v2, %v1573_v2  ;;  %v361_v5 = vcombine.high %v1575_v3, %v1575_v3  ;;  %v365_v6 = vsel %vm364_vm0, %v1573_v2, -inf  ;;  %v379_v7 = vsel %vm364_vm0, %v1575_v3, -inf }
  0x64   : > { %v366_v8 = vrot.slane %v365_v6, 4  ;;  %v380_v9 = vrot.slane %v379_v7, 4 }
  0x65   : > { %v372_v10 = vsel %vm364_vm0, %v360_v4, -inf  ;;  %v386_v11 = vsel %vm364_vm0, %v361_v5, -inf }
  0x66   : > { %s346_s26 = scalar_lea.vmem %s1770_s28, %s1795_s22  ;;  %v367_v12 = vmax.f32 %v365_v6, %v366_v8  ;;  %v373_v13 = vrot.slane %v372_v10, 4  ;;  %v381_v14 = vmax.f32 %v379_v7, %v380_v9  ;;  %v387_v15 = vrot.slane %v386_v11, 4 }
  0x67   : > { %s1571_s29 = scalar_lea.vmem %s1771_s0, %s984_s30 }
  0x68   : > { %v368_v16 = vrot.slane %v367_v12, 2  ;;  %v374_v17 = vmax.f32 %v372_v10, %v373_v13  ;;  %v382_v18 = vrot.slane %v381_v14, 2  ;;  %v388_v19 = vmax.f32 %v386_v11, %v387_v15  ;;  %p985_p10 = scmp.ne.s32.totalorder %s1772_s18, 0 }
  0x6a   : > { %v369_v20 = vmax.f32 %v367_v12, %v368_v16  ;;  %v375_v21 = vrot.slane %v374_v17, 2  ;;  %v383_v22 = vmax.f32 %v381_v14, %v382_v18  ;;  %v389_v23 = vrot.slane %v388_v19, 2 }
  0x6c   : > { %v370_v24 = vrot.slane %v369_v20, 1  ;;  %v376_v25 = vmax.f32 %v374_v17, %v375_v21  ;;  %v384_v26 = vrot.slane %v383_v22, 1  ;;  %v390_v27 = vmax.f32 %v388_v19, %v389_v23 }
  0x6e   : > { %v371_v28 = vmax.f32 %v369_v20, %v370_v24  ;;  %v377_v29 = vrot.slane %v376_v25, 1  ;;  %v385_v30 = vmax.f32 %v383_v22, %v384_v26  ;;  %v391_v31 = vrot.slane %v390_v27, 1 }
  0x70   : > { %v378_v32 = vmax.f32 %v376_v25, %v377_v29  ;;  %v392_v33 = vmax.f32 %v390_v27, %v391_v31 }
  0x72   : > { %v397_v34 = vcombine.low %v371_v28, %v378_v32  ;;  %v398_v35 = vcombine.low %v385_v30, %v392_v33 }
  0x74   : > { %v401_v36 = vsub.f32 %v1573_v2, %v397_v34  ;;  %v402_v37 = vsub.f32 %v1575_v3, %v398_v35 }
  0x76   : > { %v403_v38 = vmul.f32 1.442695, %v401_v36  ;;  %v405_v39 = vmul.f32 1.442695, %v402_v37 }
  0x78   : > { %1103 = vpow2.f32 %v403_v38 }
  0x79   : > { %1105 = vpow2.f32 %v405_v39 }
  0x85   : > { %v1104_v40 = vpop.eup %1103 }
  0x86   : > { %v1106_v41 = vpop.eup %1105  ;;  %v409_v42 = vcombine.high %v1104_v40, %v1104_v40  ;;  %v413_v43 = vsel %vm364_vm0, %v1104_v40, 0.0 }
  0x87   : > { %v410_v44 = vcombine.high %v1106_v41, %v1106_v41  ;;  %v414_v45 = vrot.slane %v413_v43, 4  ;;  %v427_v46 = vsel %vm364_vm0, %v1106_v41, 0.0 }
  0x88   : > { %v420_v47 = vsel %vm364_vm0, %v409_v42, 0.0  ;;  %v428_v48 = vrot.slane %v427_v46, 4 }
  0x89   : > { %v415_v49 = vadd.f32 %v414_v45, %v413_v43  ;;  %v421_v50 = vrot.slane %v420_v47, 4  ;;  %v434_v51 = vsel %vm364_vm0, %v410_v44, 0.0 }
  0x8a   : > { %v429_v52 = vadd.f32 %v428_v48, %v427_v46  ;;  %v435_v53 = vrot.slane %v434_v51, 4 }
  0x8b   : > { %v416_v54 = vrot.slane %v415_v49, 2  ;;  %v422_v55 = vadd.f32 %v421_v50, %v420_v47 }
  0x8c   : > { %v430_v56 = vrot.slane %v429_v52, 2  ;;  %v436_v57 = vadd.f32 %v435_v53, %v434_v51 }
  0x8d   : > { %v417_v58 = vadd.f32 %v416_v54, %v415_v49  ;;  %v423_v59 = vrot.slane %v422_v55, 2 }
  0x8e   : > { %v431_v60 = vadd.f32 %v430_v56, %v429_v52  ;;  %v437_v61 = vrot.slane %v436_v57, 2 }
  0x8f   : > { %v418_v62 = vrot.slane %v417_v58, 1  ;;  %v424_v63 = vadd.f32 %v423_v59, %v422_v55 }
  0x90   : > { %v432_v0 = vrot.slane %v431_v60, 1  ;;  %v438_v1 = vadd.f32 %v437_v61, %v436_v57 }
  0x91   : > { %v419_v4 = vadd.f32 %v418_v62, %v417_v58  ;;  %v425_v5 = vrot.slane %v424_v63, 1 }
  0x92   : > { %v433_v6 = vadd.f32 %v432_v0, %v431_v60  ;;  %v439_v7 = vrot.slane %v438_v1, 1 }
  0x93   : > { %v426_v8 = vadd.f32 %v425_v5, %v424_v63  ;;  %1107 = vlog2.f32 %v419_v4 }
  0x94   : > { %v440_v9 = vadd.f32 %v439_v7, %v438_v1  ;;  %1109 = vlog2.f32 %v433_v6 }
  0x95   : > { %1111 = vlog2.f32 %v426_v8 }
  0x96   : > { %1113 = vlog2.f32 %v440_v9 }
  0xa0   : > { %v1108_v10 = vpop.eup %1107 }
  0xa1   : > { %v1110_v11 = vpop.eup %1109  ;;  %v442_v12 = vmul.f32 0.6931472, %v1108_v10 }
  0xa2   : > { %v1112_v13 = vpop.eup %1111  ;;  %v446_v14 = vmul.f32 0.6931472, %v1110_v11 }
  0xa3   : > { %v1114_v15 = vpop.eup %1113  ;;  %v444_v16 = vmul.f32 0.6931472, %v1112_v13  ;;  %v449_v17 = vadd.f32 %v442_v12, %v371_v28 }
  0xa4   : > { %v448_v18 = vmul.f32 0.6931472, %v1114_v15  ;;  %v451_v19 = vadd.f32 %v446_v14, %v385_v30 }
  0xa5   : > { %v450_v20 = vadd.f32 %v444_v16, %v378_v32 }
  0xa6   : > { %v452_v21 = vadd.f32 %v448_v18, %v392_v33  ;;  %466 = sbr.rel (%p985_p10) target bundleno = 338 (0x152), region = 48 }
  0xa7   : > { %v457_v22 = vcombine.low %v449_v17, %v450_v20 }
  0xa8   : > { %v458_v23 = vcombine.low %v451_v19, %v452_v21 }
  0xa9   : > { %v1594_v24 = vsub.f32 %v1573_v2, %v457_v22 }
  0xaa   : > { %v1597_v25 = vsub.f32 %v1575_v3, %v458_v23 }
  0xab   : > { %v467_v26 = vld [vmem:[%s1540_s13] sm:$0xff]  ;;  %v468_v27 = vld [vmem:[%s1540_s13 + $0x8] sm:$0xff]  ;;  %v469_v32 = vld [vmem:[%s1540_s13 + $0x10] sm:$0xff]  ;;  %vm726_vm1 = vcmask 3072  }
  0xac   : > { %v471_v28 = vld [vmem:[%s1548_s7] sm:$0xff]  ;;  %v472_v29 = vld [vmem:[%s1548_s7 + $0x8] sm:$0xff]  ;;  %v697_v2 = vcombine.high %v467_v26, %v467_v26  ;;  %v698_v30 = vcombine.high %v468_v27, %v468_v27  ;;  %v705_v3 = vsel %vm364_vm0, %v467_v26, 0.0  ;;  %v708_v31 = vsel %vm364_vm0, %v468_v27, 0.0  ;;  %v1608_v33 = vld [vmem:[%s1540_s13 + $0x18] sm:$0xff] }
  0xad   : > { %v476_v34 = vsub.f32 %v468_v27, %v472_v29  ;;  %v475_v35 = vsub.f32 %v467_v26, %v471_v28  ;;  %v473_v36 = vld [vmem:[%s1548_s7 + $0x10] sm:$0xff]  ;;  %v474_v37 = vld [vmem:[%s1548_s7 + $0x18] sm:$0xff]  ;;  %v699_v38 = vcombine.high %v469_v32, %v469_v32  ;;  %v700_v39 = vcombine.high %v1608_v33, %v1608_v33 }
  0xae   : > { %v706_v40 = vsel %vm364_vm0, %v697_v2, 0.0  ;;  %v710_v41 = vsel %vm364_vm0, %v698_v30, 0.0  ;;  %v477_v42 = vsub.f32 %v469_v32, %v473_v36  ;;  %v478_v43 = vsub.f32 %v1608_v33, %v474_v37 }
  0xaf   : > { %v1617_v44 = vmul.f32 14.285714, %v476_v34  ;;  %v707_v45 = vadd.f32 %v706_v40, %v705_v3  ;;  %v1619_v46 = vmul.f32 14.285714, %v475_v35  ;;  %v714_v47 = vsel %vm364_vm0, %v469_v32, 0.0 }
  0xb0   : > { %v1622_v48 = vmul.f32 14.285714, %v477_v42  ;;  %v1624_v49 = vmul.f32 14.285714, %v478_v43  ;;  %v715_v50 = vsel %vm364_vm0, %v699_v38, 0.0  ;;  %v1629_v51 = vsel %vm364_vm0, %v1608_v33, 0.0 }
  0xb1   : > { %v488_v52 = vcombine.high %v1617_v44, %v1617_v44  ;;  %v509_v53 = vsel %vm364_vm0, %v1617_v44, -inf  ;;  %v709_v54 = vadd.f32 %v708_v31, %v707_v45  ;;  %v487_v55 = vcombine.high %v1619_v46, %v1619_v46 }
  0xb2   : > { %v510_v56 = vrot.slane %v509_v53, 4  ;;  %v495_v57 = vsel %vm364_vm0, %v1619_v46, -inf  ;;  %v489_v58 = vcombine.high %v1622_v48, %v1622_v48  ;;  %v490_v59 = vcombine.high %v1624_v49, %v1624_v49 }
  0xb3   : > { %v516_v60 = vsel %vm364_vm0, %v488_v52, -inf  ;;  %v711_v61 = vadd.f32 %v710_v41, %v709_v54  ;;  %v496_v62 = vrot.slane %v495_v57, 4  ;;  %v502_v63 = vsel %vm364_vm0, %v487_v55, -inf }
  0xb4   : > { %v511_v0 = vmax.f32 %v509_v53, %v510_v56  ;;  %v517_v1 = vrot.slane %v516_v60, 4  ;;  %v503_v4 = vrot.slane %v502_v63, 4  ;;  %v523_v5 = vsel %vm364_vm0, %v1622_v48, -inf }
  0xb5   : > { %712 = vadd.xlane.f32.xlu0 %v711_v61  ;;  %v497_v6 = vmax.f32 %v495_v57, %v496_v62  ;;  %v524_v7 = vrot.slane %v523_v5, 4  ;;  %v530_v8 = vsel %vm364_vm0, %v489_v58, -inf  ;;  %v537_v9 = vsel %vm364_vm0, %v1624_v49, -inf }
  0xb6   : > { %v512_v10 = vrot.slane %v511_v0, 2  ;;  %v518_v11 = vmax.f32 %v516_v60, %v517_v1  ;;  %v504_v12 = vmax.f32 %v502_v63, %v503_v4  ;;  %v531_v13 = vrot.slane %v530_v8, 4 }
  0xb7   : > { %v498_v14 = vrot.slane %v497_v6, 2  ;;  %v525_v15 = vmax.f32 %v523_v5, %v524_v7  ;;  %v538_v16 = vrot.slane %v537_v9, 4  ;;  %v544_v17 = vsel %vm364_vm0, %v490_v59, -inf }
  0xb8   : > { %v513_v18 = vmax.f32 %v511_v0, %v512_v10  ;;  %v519_v19 = vrot.slane %v518_v11, 2  ;;  %v505_v20 = vrot.slane %v504_v12, 2  ;;  %v532_v21 = vmax.f32 %v530_v8, %v531_v13 }
  0xb9   : > { %v499_v22 = vmax.f32 %v497_v6, %v498_v14  ;;  %v526_v23 = vrot.slane %v525_v15, 2  ;;  %v539_v26 = vmax.f32 %v537_v9, %v538_v16  ;;  %v545_v27 = vrot.slane %v544_v17, 4 }
  0xba   : > { %v514_v28 = vrot.slane %v513_v18, 1  ;;  %v520_v29 = vmax.f32 %v518_v11, %v519_v19  ;;  %v506_v2 = vmax.f32 %v504_v12, %v505_v20  ;;  %v533_v30 = vrot.slane %v532_v21, 2 }
  0xbb   : > { %v500_v3 = vrot.slane %v499_v22, 1  ;;  %v527_v31 = vmax.f32 %v525_v15, %v526_v23  ;;  %v540_v32 = vrot.slane %v539_v26, 2  ;;  %v546_v34 = vmax.f32 %v544_v17, %v545_v27 }
  0xbc   : > { %v515_v35 = vmax.f32 %v513_v18, %v514_v28  ;;  %v521_v36 = vrot.slane %v520_v29, 1  ;;  %v507_v37 = vrot.slane %v506_v2, 1  ;;  %v534_v38 = vmax.f32 %v532_v21, %v533_v30 }
  0xbd   : > { %v501_v40 = vmax.f32 %v499_v22, %v500_v3  ;;  %v528_v41 = vrot.slane %v527_v31, 1  ;;  %v541_v42 = vmax.f32 %v539_v26, %v540_v32  ;;  %v547_v43 = vrot.slane %v546_v34, 2 }
  0xbe   : > { %v522_v45 = vmax.f32 %v520_v29, %v521_v36  ;;  %v508_v52 = vmax.f32 %v506_v2, %v507_v37  ;;  %v535_v53 = vrot.slane %v534_v38, 1  ;;  %v716_v54 = vadd.f32 %v715_v50, %v714_v47 }
  0xbf   : > { %v529_v55 = vmax.f32 %v527_v31, %v528_v41  ;;  %v542_v56 = vrot.slane %v541_v42, 1  ;;  %v548_v57 = vmax.f32 %v546_v34, %v547_v43  ;;  %v719_v58 = vsel %vm364_vm0, %v700_v39, 0.0 }
  0xc0   : > { %v560_v59 = vcombine.low %v515_v35, %v522_v45  ;;  %v559_v60 = vcombine.low %v501_v40, %v508_v52  ;;  %v536_v61 = vmax.f32 %v534_v38, %v535_v53  ;;  %v718_v62 = vadd.f32 %v1629_v51, %v716_v54 }
  0xc1   : > { %v543_v63 = vmax.f32 %v541_v42, %v542_v56  ;;  %v549_v0 = vrot.slane %v548_v57, 1 }
  0xc2   : > { %v568_v1 = vsub.f32 %v1617_v44, %v560_v59  ;;  %v567_v4 = vsub.f32 %v1619_v46, %v559_v60  ;;  %v561_v47 = vcombine.low %v529_v55, %v536_v61  ;;  %v720_v50 = vadd.f32 %v719_v58, %v718_v62 }
  0xc3   : > { %v550_v5 = vmax.f32 %v548_v57, %v549_v0 }
  0xc4   : > { %v573_v6 = vmul.f32 1.442695, %v568_v1  ;;  %v571_v7 = vmul.f32 1.442695, %v567_v4  ;;  %v569_v33 = vsub.f32 %v1622_v48, %v561_v47  ;;  %721 = vadd.xlane.f32.xlu0 %v720_v50 }
  0xc5   : > { %v562_v39 = vcombine.low %v543_v63, %v550_v5 }
  0xc6   : > { %1119 = vpow2.f32 %v573_v6  ;;  %v575_v8 = vmul.f32 1.442695, %v569_v33 }
  0xc7   : > { %1121 = vpow2.f32 %v571_v7  ;;  %v570_v51 = vsub.f32 %v1624_v49, %v562_v39 }
  0xc8   : > { %1123 = vpow2.f32 %v575_v8 }
  0xc9   : > { %v577_v9 = vmul.f32 1.442695, %v570_v51 }
  0xcb   : > { %1125 = vpow2.f32 %v577_v9 }
  0xd3   : > { %v1660_v44 = vpop.eup %1119 }
  0xd4   : > { %v1662_v46 = vpop.eup %1121  ;;  %v584_v10 = vcombine.high %v1660_v44, %v1660_v44  ;;  %v605_v48 = vsel %vm364_vm0, %v1660_v44, 0.0 }
  0xd5   : > { %v1668_v11 = vpop.eup %1123  ;;  %v606_v12 = vrot.slane %v605_v48, 4  ;;  %v583_v13 = vcombine.high %v1662_v46, %v1662_v46  ;;  %v591_v49 = vsel %vm364_vm0, %v1662_v46, 0.0 }
  0xd6   : > { %v612_v14 = vsel %vm364_vm0, %v584_v10, 0.0  ;;  %v592_v15 = vrot.slane %v591_v49, 4  ;;  %v585_v16 = vcombine.high %v1668_v11, %v1668_v11  ;;  %v619_v17 = vsel %vm364_vm0, %v1668_v11, 0.0 }
  0xd7   : > { %v607_v18 = vadd.f32 %v606_v12, %v605_v48  ;;  %v613_v19 = vrot.slane %v612_v14, 4  ;;  %v598_v20 = vsel %vm364_vm0, %v583_v13, 0.0  ;;  %v620_v21 = vrot.slane %v619_v17, 4 }
  0xd8   : > { %v1680_v22 = vpop.eup %1125  ;;  %v593_v23 = vadd.f32 %v592_v15, %v591_v49  ;;  %v599_v26 = vrot.slane %v598_v20, 4  ;;  %v626_v27 = vsel %vm364_vm0, %v585_v16, 0.0 }
  0xd9   : > { %v608_v28 = vrot.slane %v607_v18, 2  ;;  %v614_v29 = vadd.f32 %v613_v19, %v612_v14  ;;  %v586_v2 = vcombine.high %v1680_v22, %v1680_v22  ;;  %v621_v30 = vadd.f32 %v620_v21, %v619_v17 }
  0xda   : > { %v594_v3 = vrot.slane %v593_v23, 2  ;;  %v600_v31 = vadd.f32 %v599_v26, %v598_v20  ;;  %v627_v32 = vrot.slane %v626_v27, 4  ;;  %v633_v34 = vsel %vm364_vm0, %v1680_v22, 0.0 }
  0xdb   : > { %v609_v35 = vadd.f32 %v608_v28, %v607_v18  ;;  %v615_v36 = vrot.slane %v614_v29, 2  ;;  %v622_v37 = vrot.slane %v621_v30, 2  ;;  %v634_v38 = vrot.slane %v633_v34, 4 }
  0xdc   : > { %v595_v40 = vadd.f32 %v594_v3, %v593_v23  ;;  %v601_v41 = vrot.slane %v600_v31, 2  ;;  %v628_v42 = vadd.f32 %v627_v32, %v626_v27  ;;  %v640_v43 = vsel %vm364_vm0, %v586_v2, 0.0 }
  0xdd   : > { %v610_v45 = vrot.slane %v609_v35, 1  ;;  %v616_v52 = vadd.f32 %v615_v36, %v614_v29  ;;  %v623_v53 = vadd.f32 %v622_v37, %v621_v30  ;;  %v635_v54 = vadd.f32 %v634_v38, %v633_v34 }
  0xde   : > { %v596_v55 = vrot.slane %v595_v40, 1  ;;  %v602_v56 = vadd.f32 %v601_v41, %v600_v31  ;;  %v629_v57 = vrot.slane %v628_v42, 2  ;;  %v641_v58 = vrot.slane %v640_v43, 4 }
  0xdf   : > { %v611_v59 = vadd.f32 %v610_v45, %v609_v35  ;;  %v617_v60 = vrot.slane %v616_v52, 1  ;;  %v624_v61 = vrot.slane %v623_v53, 1  ;;  %v636_v62 = vrot.slane %v635_v54, 2 }
  0xe0   : > { %v597_v63 = vadd.f32 %v596_v55, %v595_v40  ;;  %v603_v0 = vrot.slane %v602_v56, 1  ;;  %v630_v1 = vadd.f32 %v629_v57, %v628_v42  ;;  %v642_v4 = vadd.f32 %v641_v58, %v640_v43 }
  0xe1   : > { %v618_v47 = vadd.f32 %v617_v60, %v616_v52  ;;  %1127 = vrcp.f32 %v611_v59  ;;  %v625_v50 = vadd.f32 %v624_v61, %v623_v53  ;;  %v637_v5 = vadd.f32 %v636_v62, %v635_v54 }
  0xe2   : > { %v604_v6 = vadd.f32 %v603_v0, %v602_v56  ;;  %1129 = vrcp.f32 %v597_v63  ;;  %v631_v7 = vrot.slane %v630_v1, 1  ;;  %v643_v33 = vrot.slane %v642_v4, 2 }
  0xe3   : > { %1131 = vrcp.f32 %v618_v47  ;;  %v638_v39 = vrot.slane %v637_v5, 1 }
  0xe4   : > { %1133 = vrcp.f32 %v604_v6  ;;  %v632_v8 = vadd.f32 %v631_v7, %v630_v1  ;;  %v644_v51 = vadd.f32 %v643_v33, %v642_v4 }
  0xe5   : > { %v639_v9 = vadd.f32 %v638_v39, %v637_v5  ;;  %1135 = vrcp.f32 %v625_v50 }
  0xe6   : > { %v645_v10 = vrot.slane %v644_v51, 1  ;;  %1137 = vrcp.f32 %v632_v8 }
  0xe7   : > { %1139 = vrcp.f32 %v639_v9 }
  0xe8   : > { %v646_v48 = vadd.f32 %v645_v10, %v644_v51 }
  0xea   : > { %1141 = vrcp.f32 %v646_v48 }
  0xee   : > { %v1128_v12 = vpop.eup %1127 }
  0xef   : > { %v1130_v13 = vpop.eup %1129 }
  0xf0   : > { %v1132_v49 = vpop.eup %1131 }
  0xf1   : > { %v1134_v14 = vpop.eup %1133  ;;  %v672_v15 = vcombine.low %v1128_v12, %v1132_v49 }
  0xf2   : > { %v1136_v16 = vpop.eup %1135  ;;  %v671_v17 = vcombine.low %v1130_v13, %v1134_v14 }
  0xf3   : > { %v1138_v18 = vpop.eup %1137  ;;  %v680_v19 = vmul.f32 %v1660_v44, %v672_v15 }
  0xf4   : > { %v679_v20 = vmul.f32 %v1662_v46, %v671_v17  ;;  %v673_v21 = vcombine.low %v1136_v16, %v1138_v18  ;;  %v1140_v23 = vpop.eup %1139 }
  0xf5   : > { %684 = vst [vmem:[#allocation2 + $0x8] sm:$0xff] %v680_v19 }
  0xf6   : > { %683 = vst [vmem:[#allocation2] sm:$0xff] %v679_v20  ;;  %v681_v26 = vmul.f32 %v1668_v11, %v673_v21 }
  0xf7   : > { %v1142_v27 = vpop.eup %1141 }
  0xf8   : > { %v674_v28 = vcombine.low %v1140_v23, %v1142_v27  ;;  %v689_v29 = vmul.f32 %v681_v26, %v1594_v24  ;;  %v685_v2 = vadd.f32 %v681_v26, %v679_v20 }
  0xfa   : > { %v682_v30 = vmul.f32 %v1680_v22, %v674_v28  ;;  %691 = vst [vmem:[#allocation4 + $0x8] sm:$0xff] %v689_v29  ;;  %687 = vst [vmem:[#allocation3 + $0x8] sm:$0xff] %v685_v2 }
  0xfc   : > { %v686_v3 = vadd.f32 %v682_v30, %v680_v19  ;;  %v690_v44 = vmul.f32 %v682_v30, %v1597_v25 }
  0xfe   : > { %688 = vst [vmem:[#allocation3] sm:$0xff] %v686_v3  ;;  %692 = vst [vmem:[#allocation4] sm:$0xff] %v690_v44 }
 0x13e   : > { %v713_v46 = vpop.xlane.xlu0 %712 }
 0x13f   : > { %v723_v32 = vsel %vm364_vm0, %v713_v46, 0.0 }
 0x14d   : > { %v722_v31 = vpop.xlane.xlu0 %721 }
 0x14e   : > { %v724_v11 = vsel %vm364_vm0, %v722_v31, 0.0 }
 0x14f   : > { %v725_v34 = vadd.f32 %v724_v11, %v723_v32 }
 0x151   : > { %727 = vst.msk [vmem:[%s1571_s29] sm:$0xf] %vm726_vm1, %v725_v34 }
 0x152 PF: > { %s1773_s15 = sld [smem:[#allocation13_spill]] }
 0x158   : > { %p986_p2 = scmp.ne.s32.totalorder %s1773_s15, 1 }
 0x15a   : > { %731 = sbr.rel (%p986_p2) target bundleno = 358 (0x166), region = 52 }
 0x15f   : > { %v732_v22 = vld [vmem:[#allocation4 + $0x8] sm:$0xff]  ;;  %v734_v35 = vld [vmem:[#allocation2] sm:$0xff] }
 0x160   : > { %v736_v36 = vmul.f32 %v734_v35, %v1594_v24  ;;  %v733_v37 = vld [vmem:[#allocation4] sm:$0xff]  ;;  %v735_v38 = vld [vmem:[#allocation2 + $0x8] sm:$0xff] }
 0x161   : > { %v737_v40 = vmul.f32 %v735_v38, %v1597_v25 }
 0x162   : > { %v738_v41 = vadd.f32 %v736_v36, %v732_v22 }
 0x163   : > { %v739_v42 = vadd.f32 %v737_v40, %v733_v37 }
 0x164   : > { %740 = vst [vmem:[#allocation4 + $0x8] sm:$0xff] %v738_v41 }
 0x165   : > { %741 = vst [vmem:[#allocation4] sm:$0xff] %v739_v42 }
 0x166 PF: > { %s1774_s13 = sld [smem:[#allocation13_spill]] }
 0x16c   : > { %p987_p7 = scmp.lt.s32.totalorder %s1774_s13, 2 }
 0x16e   : > { %745 = sbr.rel (%p987_p7) target bundleno = 378 (0x17a), region = 56 }
 0x173   : > { %v746_v43 = vld [vmem:[#allocation4 + $0x8] sm:$0xff]  ;;  %v748_v45 = vld [vmem:[#allocation3 + $0x8] sm:$0xff]  ;;  %v747_v53 = vld [vmem:[#allocation4] sm:$0xff] }
 0x174   : > { %v750_v52 = vmul.f32 %v748_v45, %v1594_v24  ;;  %v749_v54 = vld [vmem:[#allocation3] sm:$0xff] }
 0x175   : > { %v751_v55 = vmul.f32 %v749_v54, %v1597_v25 }
 0x176   : > { %v752_v56 = vadd.f32 %v750_v52, %v746_v43 }
 0x177   : > { %v753_v57 = vadd.f32 %v751_v55, %v747_v53 }
 0x178   : > { %754 = vst [vmem:[#allocation4 + $0x8] sm:$0xff] %v752_v56 }
 0x179   : > { %755 = vst [vmem:[#allocation4] sm:$0xff] %v753_v57 }
 0x17a PF: > { %s1775_s14 = sld [smem:[#allocation13_spill]] }
 0x180   : > { %p988_p13 = scmp.ne.s32.totalorder %s1775_s14, 2 }
 0x182   : > { %759 = sbr.rel (%p988_p13) target bundleno = 605 (0x25d), region = 60 }
 0x187   : > { %v760_v58 = vld [vmem:[#allocation4 + $0x8] sm:$0xff]  ;;  %v761_v59 = vld [vmem:[#allocation4] sm:$0xff]  ;;  %vm786_vm2 = vcmask 0  }
 0x188   : > { %v764_v60 = vcombine.high %v760_v58, %v760_v58  ;;  %v765_v61 = vcombine.high %v761_v59, %v761_v59  ;;  %v768_v62 = vsel %vm364_vm0, %v760_v58, 0.0  ;;  %v771_v63 = vsel %vm364_vm0, %v761_v59, 0.0 }
 0x18a   : > { %v769_v24 = vsel %vm364_vm0, %v764_v60, 0.0  ;;  %v773_v25 = vsel %vm364_vm0, %v765_v61, 0.0 }
 0x18b   : > { %v770_v0 = vadd.f32 %v769_v24, %v768_v62 }
 0x18d   : > { %v772_v1 = vadd.f32 %v771_v63, %v770_v0 }
 0x18f   : > { %v774_v4 = vadd.f32 %v773_v25, %v772_v1 }
 0x191   : > { %775 = vadd.xlane.f32.xlu0 %v774_v4 }
 0x21a   : > { %v776_v47 = vpop.xlane.xlu0 %775 }
 0x21b   : > { %v777_v50 = vrot.slane %v776_v47, 4 }
 0x21d   : > { %v778_v5 = vadd.f32 %v777_v50, %v776_v47 }
 0x21f   : > { %v779_v6 = vrot.slane %v778_v5, 2 }
 0x221   : > { %v780_v7 = vadd.f32 %v779_v6, %v778_v5 }
 0x223   : > { %v781_v33 = vrot.slane %v780_v7, 1 }
 0x225   : > { %v782_v39 = vadd.f32 %v781_v33, %v780_v7 }
 0x227   : > { %993 = vpush %v782_v39 }
 0x258   : > { %s994_s4 = spop %993 }
 0x259   : > { %s784_s10 = ssub.f32 0.0, %s994_s4 }
 0x25b   : > { %v785_v8 = vstv %s784_s10 }
 0x25c   : > { %787 = vst.msk [vmem:[%s346_s26] sm:$0x1] %vm786_vm2, %v785_v8 }
 0x25d PF: > { %s21_s25 = sadd.s32 1, %s1327_s25   ;;  %s1777_s5 = sld [smem:[#allocation14_spill]] }
 0x25e   : > { %p18_p1 = scmp.ge.s32.totalorder %s21_s25, 8   ;;  %s1778_s15 = smov %s1291_s16 }
 0x25f   : > { %s1779_s16 = smov %s1295_s17  ;;  %s1780_s17 = smov %s1517_s12 }
 0x260   : > { %s1781_s18 = smov %s1303_s19  ;;  %s1782_s19 = smov %s1307_s20 }
 0x261   : > { %s1783_s20 = smov %s1514_s11  ;;  %s1784_s21 = smov %s1319_s23 }
 0x262   : > { %s1785_s22 = smov %s1323_s24  ;;  %s1786_s23 = smov %s1789_s3 }
 0x263   : > { %s1787_s24 = smov %s1777_s5  ;;  %20 = sbr.rel (!%p18_p1) target bundleno = 14 (0xe), region = 124 }
 0x268   :  { %831 = vsyncpa [#allocation6], 1 }
 0x269   :  { %833 = vsyncpa [#allocation6 + $0x1], 1 }
 0x26a   :  { %834 = vsyncpa [#allocation8], 1 }
 0x26b   :  { %836 = vsyncpa [#allocation8 + $0x1], 1 }

</bundles_post_ra>
